<compile_context>
chip_gen: v7x
topology: tpu7x:2x2x1
jax: 0.10.0
libtpu: 0.0.40
codegen_flags: <defaults>
</compile_context>

<pallas_src>
import jax
import jax.numpy as jnp
from jax import lax
from jax.experimental import pallas as pl
from jax.experimental.pallas import tpu as pltpu


def _round_up(x, m):
    return ((x + m - 1) // m) * m


def _tpu_defaults():
    """Per-generation tile sizes and VMEM budget."""
    kind = ""
    try:
        kind = jax.devices()[0].device_kind.lower()
    except Exception:
        pass
    if "v7" in kind or "7x" in kind:
        # 64 MiB VMEM per TensorCore, 2 TCs/chip -> conservative cap.
        return dict(tm=512, tn=512, tk=512, vmem=48 * 1024 * 1024, gen="v7x")
    if "v6" in kind:
        # 128 MiB VMEM; keep tn/tk multiples of 256 for the 2x256^2 MXU.
        return dict(tm=512, tn=512, tk=1024, vmem=96 * 1024 * 1024, gen="v6e")
    if "v5" in kind:
        return dict(tm=512, tn=512, tk=512, vmem=64 * 1024 * 1024, gen="v5e")
    # Unknown generation: sizes/limit safe on every chip (incl. v7x 64 MiB).
    return dict(tm=512, tn=512, tk=512, vmem=48 * 1024 * 1024, gen="unknown")


def _vmem_estimate(tm, tn, tk, in_bytes, out_bytes):
    return (2 * (tm * tk + tn * tk) * in_bytes      # double-buffered x, w tiles
            + tm * tn * 4                           # f32 accumulator
            + 2 * tm * tn * out_bytes               # double-buffered out tile
            + 2 * tn * 4)                           # bias row


def _linear_bias_kernel(x_ref, w_ref, b_ref, o_ref, acc_ref):
    """One (tm, tn) output tile, accumulating over the K grid axis.

    x_ref:   (tm, tk)       activation tile
    w_ref:   (tn, tk)       weight tile in native PyTorch (out, in) layout
    b_ref:   (1,  tn)  f32  bias row tile (folded into acc init)
    o_ref:   (tm, tn)       output tile
    acc_ref: (tm, tn)  f32  VMEM accumulator, persistent across the K axis
    """
    k = pl.program_id(2)

    @pl.when(k == 0)
    def _():
        acc_ref[...] = jnp.broadcast_to(b_ref[...], acc_ref.shape)

    # x @ w.T on the MXU without any materialized transpose: contract the
    # last dim of both operands.
    acc_ref[...] += lax.dot_general(
        x_ref[...], w_ref[...],
        dimension_numbers=(((1,), (1,)), ((), ())),
        preferred_element_type=jnp.float32,
    )

    @pl.when(k == pl.num_programs(2) - 1)
    def _():
        o_ref[...] = acc_ref[...].astype(o_ref.dtype)


def _linear_nobias_kernel(x_ref, w_ref, o_ref, acc_ref):
    k = pl.program_id(2)

    @pl.when(k == 0)
    def _():
        acc_ref[...] = jnp.zeros_like(acc_ref)

    acc_ref[...] += lax.dot_general(
        x_ref[...], w_ref[...],
        dimension_numbers=(((1,), (1,)), ((), ())),
        preferred_element_type=jnp.float32,
    )

    @pl.when(k == pl.num_programs(2) - 1)
    def _():
        o_ref[...] = acc_ref[...].astype(o_ref.dtype)


def meta_linear(x, weight, bias=None, *, tm=None, tn=None, tk=None,
                ingest_dtype=None, vmem_limit_bytes=None):
    """y = x @ weight.T + bias  (same semantics as torch.nn.functional.linear).

    x:            (..., in_features)
    weight:       (out_features, in_features)   -- native PyTorch layout
    bias:         (out_features,) or None
    ingest_dtype: optional dtype (e.g. jnp.bfloat16) to stream x/w in; the
                  accumulation stays f32, output keeps x.dtype.
    """
    defaults = _tpu_defaults()
    gen = defaults["gen"]
    tm = defaults["tm"] if tm is None else tm
    tn = defaults["tn"] if tn is None else tn
    tk = defaults["tk"] if tk is None else tk
    vmem_limit = defaults["vmem"] if vmem_limit_bytes is None else vmem_limit_bytes

    orig_shape = x.shape
    out_dtype = x.dtype
    K = orig_shape[-1]
    x2 = x.reshape(-1, K)
    M = x2.shape[0]
    N, K2 = weight.shape
    assert K == K2, "in_features mismatch"

    if ingest_dtype is not None:
        x2 = x2.astype(ingest_dtype)
        weight = weight.astype(ingest_dtype)
    in_bytes = jnp.dtype(x2.dtype).itemsize
    out_bytes = jnp.dtype(out_dtype).itemsize

    # --- tile sizing: lane-dense multiples of (8, 128), clipped to problem ---
    tm = min(tm, _round_up(M, 8))
    tn = min(tn, _round_up(N, 128))
    tk = min(tk, _round_up(K, 128))

    # Keep double-buffered tiles comfortably inside the VMEM budget.
    while tk > 128 and _vmem_estimate(tm, tn, tk, in_bytes, out_bytes) > 0.7 * vmem_limit:
        tk = max(128, _round_up(tk // 2, 128))
    while tn > 128 and _vmem_estimate(tm, tn, tk, in_bytes, out_bytes) > 0.7 * vmem_limit:
        tn = max(128, _round_up(tn // 2, 128))

    Mp = _round_up(M, tm)
    Np = _round_up(N, tn)
    Kp = _round_up(K, tk)

    # v7x has 2 TensorCores/chip: make sure the parallel axes yield >= 2 blocks
    # when the problem has room, so one core doesn't idle.
    if gen == "v7x" and (Mp // tm) * (Np // tn) < 2:
        if Np // tn < 2 and Np >= 2 * 128 and tn > 128:
            tn = max(128, _round_up(Np // 2, 128))
            Np = _round_up(N, tn)
        elif Mp // tm < 2 and Mp >= 2 * 8 and tm > 8:
            tm = max(8, _round_up(Mp // 2, 8))
            Mp = _round_up(M, tm)

    # --- zero padding only when needed (padded K contributes 0 to the dot; ---
    # --- padded N columns carry zero bias and are sliced off afterwards)   ---
    xp = x2 if (Mp == M and Kp == K) else jnp.pad(x2, ((0, Mp - M), (0, Kp - K)))
    wp = weight if (Np == N and Kp == K) else jnp.pad(
        weight, ((0, Np - N), (0, Kp - K)))

    grid = (Mp // tm, Np // tn, Kp // tk)

    x_spec = pl.BlockSpec((tm, tk), lambda i, j, k: (i, k))
    w_spec = pl.BlockSpec((tn, tk), lambda i, j, k: (j, k))
    out_spec = pl.BlockSpec((tm, tn), lambda i, j, k: (i, j))

    cost = pl.CostEstimate(
        flops=2 * Mp * Np * Kp,
        transcendentals=0,
        bytes_accessed=(Mp * Kp * in_bytes * (Np // tn)
                        + Np * Kp * in_bytes * (Mp // tm)
                        + Mp * Np * out_bytes),
    )
    compiler_params = pltpu.CompilerParams(
        dimension_semantics=("parallel", "parallel", "arbitrary"),
        vmem_limit_bytes=vmem_limit,
    )

    if bias is not None:
        bp = bias.astype(jnp.float32).reshape(1, N)
        if Np != N:
            bp = jnp.pad(bp, ((0, 0), (0, Np - N)))
        out = pl.pallas_call(
            _linear_bias_kernel,
            out_shape=jax.ShapeDtypeStruct((Mp, Np), out_dtype),
            grid_spec=pltpu.PrefetchScalarGridSpec(
                num_scalar_prefetch=0,
                grid=grid,
                in_specs=[x_spec, w_spec,
                          pl.BlockSpec((1, tn), lambda i, j, k: (0, j))],
                out_specs=out_spec,
                scratch_shapes=[pltpu.VMEM((tm, tn), jnp.float32)],
            ),
            compiler_params=compiler_params,
            cost_estimate=cost,
        )(xp, wp, bp)
    else:
        out = pl.pallas_call(
            _linear_nobias_kernel,
            out_shape=jax.ShapeDtypeStruct((Mp, Np), out_dtype),
            grid_spec=pltpu.PrefetchScalarGridSpec(
                num_scalar_prefetch=0,
                grid=grid,
                in_specs=[x_spec, w_spec],
                out_specs=out_spec,
                scratch_shapes=[pltpu.VMEM((tm, tn), jnp.float32)],
            ),
            compiler_params=compiler_params,
            cost_estimate=cost,
        )(xp, wp)

    # Slice is a no-op (skipped) when tiles divide M and N.
    y = out if (Mp == M and Np == N) else out[:M, :N]
    return y.reshape(*orig_shape[:-1], N)


if __name__ == "__main__":
    # Deterministic synthetic parameters (shapes implied by nn.Linear(in, out)).
    in_features = 32
    out_features = 64
    batch = 16

    key = jax.random.PRNGKey(0)
    kx, kw, kb = jax.random.split(key, 3)

    x = jax.random.normal(kx, (batch, in_features), dtype=jnp.float32)
    # nn.Linear-style uniform init bound = 1/sqrt(in_features), deterministic.
    bound = 1.0 / (in_features ** 0.5)
    weight = jax.random.uniform(
        kw, (out_features, in_features), minval=-bound, maxval=bound,
        dtype=jnp.float32)
    bias = jax.random.uniform(
        kb, (out_features,), minval=-bound, maxval=bound, dtype=jnp.float32)

    y_ref = x @ weight.T + bias

    # f32 path with bias.
    y = jax.block_until_ready(meta_linear(x, weight, bias))
    assert y.shape == (batch, out_features)
    assert jnp.allclose(y, y_ref, atol=1e-5, rtol=1e-5)

    # No-bias path (dedicated kernel variant, no zeros vector materialized).
    y_nb = jax.block_until_ready(meta_linear(x, weight, None))
    assert jnp.allclose(y_nb, x @ weight.T, atol=1e-5, rtol=1e-5)

    # bf16 ingest path (f32 accumulation on the MXU, looser tolerance).
    y_bf = jax.block_until_ready(
        meta_linear(x, weight, bias, ingest_dtype=jnp.bfloat16))
    assert jnp.allclose(y_bf, y_ref, atol=1e-1, rtol=1e-1)

    print("KERNEL_OK")
</pallas_src>

<mosaic_0001>
module attributes {stable_mosaic.version = 11 : i64} {
  func.func @_linear_bias_kernel(%arg0: i32, %arg1: i32, %arg2: i32, %arg3: memref<16x128xf32, #tpu.memory_space<vmem>>, %arg4: memref<128x128xf32, #tpu.memory_space<vmem>>, %arg5: memref<1x128xf32, #tpu.memory_space<vmem>>, %arg6: memref<16x128xf32, #tpu.memory_space<vmem>>, %arg7: memref<16x128xf32, #tpu.memory_space<vmem>>) attributes {dimension_semantics = [#tpu.dimension_semantics<parallel>, #tpu.dimension_semantics<parallel>, #tpu.dimension_semantics<arbitrary>], iteration_bounds = array<i64: 1, 1, 1>, scalar_prefetch = 0 : i64, scratch_operands = 1 : i64, tpu.core_type = #tpu.core_type<tc>, window_params = [{transform_indices = @transform_0, window_bounds = array<i64: 16, 128>}, {transform_indices = @transform_1, window_bounds = array<i64: 128, 128>}, {transform_indices = @transform_2, window_bounds = array<i64: 1, 128>}, {transform_indices = @transform_3, window_bounds = array<i64: 16, 128>}]} {
    %c0_i32 = arith.constant 0 : i32
    %0 = arith.cmpi eq, %arg2, %c0_i32 : i32
    %1 = arith.extui %0 : i1 to i32
    %c0_i32_0 = arith.constant 0 : i32
    %2 = arith.cmpi ne, %1, %c0_i32_0 : i32
    scf.if %2 {
      %c0_10 = arith.constant 0 : index
      %c0_11 = arith.constant 0 : index
      %12 = vector.load %arg5[%c0_10, %c0_11] : memref<1x128xf32, #tpu.memory_space<vmem>>, vector<1x128xf32>
      %13 = vector.shape_cast %12 : vector<1x128xf32> to vector<1x128xf32>
      %14 = vector.broadcast %13 : vector<1x128xf32> to vector<16x128xf32>
      %c0_12 = arith.constant 0 : index
      %c0_13 = arith.constant 0 : index
      %15 = vector.load %arg7[%c0_12, %c0_13] : memref<16x128xf32, #tpu.memory_space<vmem>>, vector<16x128xf32>
      tpu.vector_store %arg7[%c0_12, %c0_13], %14 {strides = array<i32>} : memref<16x128xf32, #tpu.memory_space<vmem>>, vector<16x128xf32>,
    } else {
    }
    %c0 = arith.constant 0 : index
    %c0_1 = arith.constant 0 : index
    %3 = vector.load %arg7[%c0, %c0_1] : memref<16x128xf32, #tpu.memory_space<vmem>>, vector<16x128xf32>
    %c0_2 = arith.constant 0 : index
    %c0_3 = arith.constant 0 : index
    %4 = vector.load %arg3[%c0_2, %c0_3] : memref<16x128xf32, #tpu.memory_space<vmem>>, vector<16x128xf32>
    %c0_4 = arith.constant 0 : index
    %c0_5 = arith.constant 0 : index
    %5 = vector.load %arg4[%c0_4, %c0_5] : memref<128x128xf32, #tpu.memory_space<vmem>>, vector<128x128xf32>
    %cst = arith.constant dense<0.000000e+00> : vector<16x128xf32>
    %6 = tpu.matmul %4, %5, %cst {dimension_numbers = #tpu.dot_dimension_numbers<[1], [1], [0], [0], [0, 0, 1, 0], [], []>} : vector<16x128xf32>, vector<128x128xf32>, vector<16x128xf32> -> vector<16x128xf32>
    %7 = arith.addf %3, %6 : vector<16x128xf32>
    %c0_6 = arith.constant 0 : index
    %c0_7 = arith.constant 0 : index
    %8 = vector.load %arg7[%c0_6, %c0_7] : memref<16x128xf32, #tpu.memory_space<vmem>>, vector<16x128xf32>
    tpu.vector_store %arg7[%c0_6, %c0_7], %7 {strides = array<i32>} : memref<16x128xf32, #tpu.memory_space<vmem>>, vector<16x128xf32>,
    %c0_i32_8 = arith.constant 0 : i32
    %9 = arith.cmpi eq, %arg2, %c0_i32_8 : i32
    %10 = arith.extui %9 : i1 to i32
    %c0_i32_9 = arith.constant 0 : i32
    %11 = arith.cmpi ne, %10, %c0_i32_9 : i32
    scf.if %11 {
      %c0_10 = arith.constant 0 : index
      %c0_11 = arith.constant 0 : index
      %12 = vector.load %arg7[%c0_10, %c0_11] : memref<16x128xf32, #tpu.memory_space<vmem>>, vector<16x128xf32>
      %c0_12 = arith.constant 0 : index
      %c0_13 = arith.constant 0 : index
      %13 = vector.load %arg6[%c0_12, %c0_13] : memref<16x128xf32, #tpu.memory_space<vmem>>, vector<16x128xf32>
      tpu.vector_store %arg6[%c0_12, %c0_13], %12 {strides = array<i32>} : memref<16x128xf32, #tpu.memory_space<vmem>>, vector<16x128xf32>,
    } else {
    }
    return
  }
  func.func @transform_0(%arg0: i32, %arg1: i32, %arg2: i32) -> (i32, i32) {
    %c0_i32 = arith.constant 0 : i32
    return %arg0, %arg2 : i32, i32
  }
  func.func @transform_1(%arg0: i32, %arg1: i32, %arg2: i32) -> (i32, i32) {
    %c0_i32 = arith.constant 0 : i32
    return %arg1, %arg2 : i32, i32
  }
  func.func @transform_2(%arg0: i32, %arg1: i32, %arg2: i32) -> (i32, i32) {
    %c0_i32 = arith.constant 0 : i32
    %c0_i32_0 = arith.constant 0 : i32
    return %c0_i32, %arg1 : i32, i32
  }
  func.func @transform_3(%arg0: i32, %arg1: i32, %arg2: i32) -> (i32, i32) {
    %c0_i32 = arith.constant 0 : i32
    return %arg0, %arg1 : i32, i32
  }
}

</mosaic_0001>

<bundles_post_ra>
// kernel: tpu_custom_call.1
= control target key start
LH: loop header
LB: loop body
LE: loop exit
PB: predicated region body
PF: predicated region fallthrough
CT: control target
= control target key end

     0   :  { %8 = vsyncpa [#allocation4], 0  ;;  %s416_s0 = inlined_call_operand.hbm [shape: f32[16,128], index: 0, kind: input, shape index: {}]   ;;  %s417_s1 = inlined_call_operand.hbm [shape: f32[128,128], index: 1, kind: input, shape index: {}]   ;;  %s418_s2 = inlined_call_operand.vmem [shape: f32[1,128], index: 2, kind: input, shape index: {}]   ;;  %s419_s3 = inlined_call_operand.hbm [shape: f32[16,128], index: 3, kind: output, shape index: {}]  }
   0x1   :  { %9 = vsyncpa [#allocation7], 0 }
   0x2   :  { %10 = vsyncpa [#allocation5], 0  ;;  %s343_s12 = smov [#allocation3]   ;;  %s271_s16 = scalar_lea.hbm %s416_s0, 256 }
   0x3   :  { %s16_s13 = sshll.u32 %s343_s12, 4  ;;  %p272_p0 = scmp.ne.s32.totalorder %s416_s0, %s271_s16  ;;  %s17_s13 = int_to_ptr.vmem [resolvable:$true] %s16_s13 }
   0x4   :  { %p275_p1 = scmp.lt.u32.totalorder %s271_s16, %s416_s0 }
   0x6   :  { %p277_p2 = pnand %p275_p1, %p272_p0 }
   0x8   :  { %280 = shalt.err (!%p277_p2)
}
   0x9   :  { %s281_s21 = scalar_lea.vmem %s17_s13, 256  ;;  %p286_p4 = scmp.lt.s32.totalorder %s17_s13, %s17_s13 }
   0xa   :  { %p282_p3 = scmp.ne.s32.totalorder %s17_s13, %s281_s21  ;;  %p287_p5 = scmp.lt.s32.totalorder %s281_s21, %s281_s21 }
   0xc   :  { %p288_p6 = por %p287_p5, %p286_p4 }
   0xe   :  { %p289_p7 = pnand %p288_p6, %p282_p3 }
  0x10   :  { %292 = shalt.err (!%p289_p7)
}
  0x11   :  { %s344_s22 = smov 128   ;;  %s345_s23 = smov 8  }
  0x12   :  { %22 = dma.hbm_to_vmem [thread:$0]  %s416_s0, 256, %s17_s13, [#allocation4], %s344_s22, %s344_s22, %s345_s23  }
  0x13   :  { %s346_s26 = smov [#allocation6]   ;;  %s293_s30 = scalar_lea.hbm %s417_s1, 2048 }
  0x14   :  { %s28_s27 = sshll.u32 %s346_s26, 4  ;;  %p294_p8 = scmp.ne.s32.totalorder %s417_s1, %s293_s30  ;;  %s29_s27 = int_to_ptr.vmem [resolvable:$true] %s28_s27 }
  0x15   :  { %p297_p9 = scmp.lt.u32.totalorder %s293_s30, %s417_s1 }
  0x17   :  { %p299_p10 = pnand %p297_p9, %p294_p8 }
  0x19   :  { %302 = shalt.err (!%p299_p10)
}
  0x1a   :  { %s303_s8 = scalar_lea.vmem %s29_s27, 2048  ;;  %p308_p12 = scmp.lt.s32.totalorder %s29_s27, %s29_s27 }
  0x1b   :  { %p304_p11 = scmp.ne.s32.totalorder %s29_s27, %s303_s8  ;;  %p309_p13 = scmp.lt.s32.totalorder %s303_s8, %s303_s8 }
  0x1d   :  { %p310_p0 = por %p309_p13, %p308_p12 }
  0x1f   :  { %p311_p1 = pnand %p310_p0, %p304_p11 }
  0x21   :  { %314 = shalt.err (!%p311_p1)
}
  0x22   :  { %34 = dma.hbm_to_vmem [thread:$0]  %s417_s1, 2048, %s29_s27, [#allocation7], %s344_s22, %s344_s22, %s345_s23  }
  0x23   :  { %337 = dma.done.wait [#allocation4], 256  }
  0x24   :  { %338 = vsyncadd [#allocation4], 4294967040 }
  0x25   :  { %339 = dma.done.wait [#allocation7], 2048  }
  0x26   :  { %340 = vsyncadd [#allocation7], 4294965248  ;;  %v60_v0 = vld [vmem:[#allocation6] sm:$0xff]  ;;  %v61_v1 = vld [vmem:[#allocation6 + $0x8] sm:$0xff]  ;;  %s347_s11 = smov [#allocation8]  }
  0x27   :  { %v62_v2 = vld [vmem:[#allocation6 + $0x10] sm:$0xff]  ;;  %v234_v3 = vpack.c.bf16 %v61_v1, %v60_v0  ;;  %v63_v4 = vld [vmem:[#allocation6 + $0x18] sm:$0xff]  ;;  %v64_v7 = vld [vmem:[#allocation6 + $0x20] sm:$0xff]  ;;  %s167_s12 = sshll.u32 %s347_s11, 4  ;;  %s168_s12 = int_to_ptr.vmem [resolvable:$true] %s167_s12 }
  0x28   :  { %v238_v5 = vpack.c.bf16 %v63_v4, %v62_v2  ;;  %v58_v6 = vld [vmem:[#allocation3] sm:$0xff]  ;;  %v65_v8 = vld [vmem:[#allocation6 + $0x28] sm:$0xff]  ;;  %v67_v11 = vld [vmem:[#allocation6 + $0x38] sm:$0xff]  ;;  %s315_s13 = scalar_lea.vmem %s168_s12, 256  ;;  %p320_p3 = scmp.lt.s32.totalorder %s168_s12, %s168_s12 }
  0x29   :  { %235 = vmatprep.subr.bf16.mxu0 %v234_v3  ;;  %231 = vmatprep.mubr.f32.mxu0 %v58_v6  ;;  %v242_v9 = vpack.c.bf16 %v65_v8, %v64_v7  ;;  %v66_v10 = vld [vmem:[#allocation6 + $0x30] sm:$0xff]  ;;  %v68_v13 = vld [vmem:[#allocation6 + $0x40] sm:$0xff]  ;;  %v69_v14 = vld [vmem:[#allocation6 + $0x48] sm:$0xff]  ;;  %p316_p2 = scmp.ne.s32.totalorder %s168_s12, %s315_s13  ;;  %p321_p4 = scmp.lt.s32.totalorder %s315_s13, %s315_s13 }
  0x2a   :  { %237 = vmatpush3.bf16.xpose.msra.mxu0 %v234_v3  ;;  %v246_v12 = vpack.c.bf16 %v67_v11, %v66_v10  ;;  %v250_v15 = vpack.c.bf16 %v69_v14, %v68_v13  ;;  %v70_v16 = vld [vmem:[#allocation6 + $0x50] sm:$0xff]  ;;  %v71_v17 = vld [vmem:[#allocation6 + $0x58] sm:$0xff]  ;;  %v72_v19 = vld [vmem:[#allocation6 + $0x60] sm:$0xff] }
  0x2b   :  { %239 = vmatprep.subr.bf16.mxu0 %v238_v5  ;;  %v254_v18 = vpack.c.bf16 %v71_v17, %v70_v16  ;;  %v73_v20 = vld [vmem:[#allocation6 + $0x68] sm:$0xff]  ;;  %v74_v22 = vld [vmem:[#allocation6 + $0x70] sm:$0xff]  ;;  %v75_v23 = vld [vmem:[#allocation6 + $0x78] sm:$0xff]  ;;  %p322_p5 = por %p321_p4, %p320_p3 }
  0x2c   :  { %v258_v21 = vpack.c.bf16 %v73_v20, %v72_v19  ;;  %v262_v24 = vpack.c.bf16 %v75_v23, %v74_v22  ;;  %v59_v25 = vld [vmem:[#allocation3 + $0x8] sm:$0xff]  ;;  %v180_v26 = vld [vmem:[%s418_s2] ss:$0 sm:$0xff] }
  0x2d   :  { %p323_p6 = pnand %p322_p5, %p316_p2 }
  0x32   :  { %241 = vmatpush3.bf16.xpose.msra.mxu0 %v238_v5 }
  0x33   :  { %243 = vmatprep.subr.bf16.mxu0 %v242_v9 }
  0x3a   :  { %245 = vmatpush3.bf16.xpose.msra.mxu0 %v242_v9 }
  0x3b   :  { %247 = vmatprep.subr.bf16.mxu0 %v246_v12 }
  0x42   :  { %249 = vmatpush3.bf16.xpose.msra.mxu0 %v246_v12 }
  0x43   :  { %251 = vmatprep.subr.bf16.mxu0 %v250_v15 }
  0x4a   :  { %253 = vmatpush3.bf16.xpose.msra.mxu0 %v250_v15 }
  0x4b   :  { %255 = vmatprep.subr.bf16.mxu0 %v254_v18 }
  0x52   :  { %257 = vmatpush3.bf16.xpose.msra.mxu0 %v254_v18 }
  0x53   :  { %259 = vmatprep.subr.bf16.mxu0 %v258_v21 }
  0x5a   :  { %261 = vmatpush3.bf16.xpose.msra.mxu0 %v258_v21 }
  0x5b   :  { %263 = vmatprep.subr.bf16.mxu0 %v262_v24 }
  0x62   :  { %265 = vmatpush3.bf16.xpose.msra.mxu0 %v262_v24 }
  0x69   :  { %232 = vmatmul.mubr.f32.vlgmr.msra.gmra.mrb[0].mxu0 %v59_v25 }
 0x13c   :  { %v233_v27 = vpop.f32.mrb[0].mxu0 }
 0x13d   :  { %v152_v28 = vadd.f32 %v233_v27, %v180_v26  ;;  %v142_v29 = vpop.f32.mrb[1].mxu0 }
 0x13e   :  { %v151_v30 = vadd.f32 %v180_v26, %v142_v29 }
 0x13f   :  { %161 = vst [vmem:[#allocation8 + $0x8] sm:$0xff] %v152_v28 }
 0x140   :  { %160 = vst [vmem:[#allocation8] sm:$0xff] %v151_v30 }
 0x141   :  { %326 = shalt.err (!%p323_p6)
}
 0x142   :  { %s327_s2 = scalar_lea.hbm %s419_s3, 256 }
 0x143   :  { %p328_p7 = scmp.ne.s32.totalorder %s419_s3, %s327_s2  ;;  %p331_p8 = scmp.lt.u32.totalorder %s327_s2, %s419_s3 }
 0x145   :  { %p333_p9 = pnand %p331_p8, %p328_p7 }
 0x147   :  { %336 = shalt.err (!%p333_p9)
}
 0x148   :  { %173 = dma.vmem_to_hbm [thread:$0]  %s168_s12, 256, %s419_s3, [#allocation5], %s344_s22, %s344_s22, %s345_s23  }
 0x149   :  { %341 = dma.done.wait [#allocation5], 256  }
 0x14a   :  { %342 = vsyncadd [#allocation5], 4294967040 }
 0x14b   :  { %177 = vsyncpa [#allocation4], 1 }
 0x14c   :  { %178 = vsyncpa [#allocation7], 1 }
 0x14d   :  { %179 = vsyncpa [#allocation5], 1 }

</bundles_post_ra>
